<compile_context>
chip_gen: v6e
topology: v6e:2x2x1
jax: 0.10.0
libtpu: 0.0.40
codegen_flags: <defaults>
</compile_context>

<pallas_src>
import math
from functools import partial

import numpy as np
import jax
import jax.numpy as jnp
from jax.experimental import pallas as pl
from jax.experimental.pallas import tpu as pltpu


_MASK_VALUE = float(np.finfo(np.float32).min) / 2.0   # finite; exp(mask - m) == 0 exactly
_VMEM_LIMIT_BYTES = 32 * 1024 * 1024                  # safe on v5e/v6e (128 MiB) and v7x (64 MiB)


def _pick_tile(dim, target, align):
    """Largest tile <= target that divides `dim` and is a multiple of `align`.
    Falls back to the full dimension (always a legal Pallas block size)."""
    if dim <= target:
        return dim
    for t in range(target, 0, -1):
        if t % align == 0 and dim % t == 0:
            return t
    return dim


# ------------------------------ Tiled linear -------------------------------- #

def linear_kernel(x_ref, wt_ref, b_ref, o_ref, acc_ref, *, compute_dtype):
    @pl.when(pl.program_id(2) == 0)
    def _init():
        acc_ref[...] = jnp.zeros_like(acc_ref)

    acc_ref[...] += jnp.dot(x_ref[...].astype(compute_dtype),
                            wt_ref[...].astype(compute_dtype),
                            preferred_element_type=jnp.float32)

    @pl.when(pl.program_id(2) == pl.num_programs(2) - 1)
    def _finalize():
        o_ref[...] = (acc_ref[...] + b_ref[...].astype(jnp.float32)).astype(o_ref.dtype)


def pallas_linear(x, wt, b, *, compute_dtype=jnp.float32,
                  tm_target=256, tn_target=256, tk_target=512):
    """y = x @ wt + b  (wt is the already-transposed torch weight, shape (K, N))."""
    M, K = x.shape
    K2, N = wt.shape
    assert K == K2
    tm = _pick_tile(M, tm_target, 8)
    tn = _pick_tile(N, tn_target, 128)
    tk = _pick_tile(K, tk_target, 128)
    b2 = b.reshape(1, N)

    return pl.pallas_call(
        partial(linear_kernel, compute_dtype=compute_dtype),
        out_shape=jax.ShapeDtypeStruct((M, N), x.dtype),
        grid=(M // tm, N // tn, K // tk),              # reduction (K) axis last
        in_specs=[
            pl.BlockSpec((tm, tk), lambda i, j, k: (i, k)),
            pl.BlockSpec((tk, tn), lambda i, j, k: (k, j)),
            pl.BlockSpec((1, tn), lambda i, j, k: (0, j)),
        ],
        out_specs=pl.BlockSpec((tm, tn), lambda i, j, k: (i, j)),
        scratch_shapes=[pltpu.VMEM((tm, tn), jnp.float32)],
        compiler_params=pltpu.CompilerParams(
            dimension_semantics=("parallel", "parallel", "arbitrary"),
            vmem_limit_bytes=_VMEM_LIMIT_BYTES),
    )(x, wt, b2)


# ------------------------- Flash document-masked MHA ------------------------- #

def flash_attn_kernel(qblk_lo_ref, qblk_hi_ref, kvblk_lo_ref, kvblk_hi_ref,   # SMEM prefetch
                      q_ref, k_ref, v_ref, qseg_ref, kvseg_ref,               # VMEM inputs
                      o_ref,                                                  # output
                      m_sc, l_sc, acc_sc,                                     # VMEM scratch
                      *, scale, compute_dtype, approx_recip):
    qi = pl.program_id(1)
    ki = pl.program_id(2)

    @pl.when(ki == 0)
    def _init():
        m_sc[...] = jnp.full_like(m_sc, -jnp.inf)
        l_sc[...] = jnp.zeros_like(l_sc)
        acc_sc[...] = jnp.zeros_like(acc_sc)

    # Block-sparse skip: document masks are block-diagonal and segment ids are
    # nondecreasing, so a (q-block, kv-block) pair has any unmasked entry iff
    # their segment-id ranges overlap.  The ranges live in SMEM (scalar prefetch),
    # so this is a pure scalar test and masked blocks skip both MXU dots and exp.
    overlaps = jnp.logical_and(qblk_lo_ref[qi] <= kvblk_hi_ref[ki],
                               kvblk_lo_ref[ki] <= qblk_hi_ref[qi])

    @pl.when(overlaps)
    def _compute():
        # Fold 1/sqrt(d_head) into q (tq x Dh elems) instead of the (tq, tk) scores.
        q = (q_ref[0] * scale).astype(compute_dtype)          # (tq, Dh)
        k = k_ref[0].astype(compute_dtype)                    # (tk, Dh)
        # Contract on the feature dim directly -> no materialized k.T (no XLU transpose).
        s = jax.lax.dot_general(q, k, (((1,), (1,)), ((), ())),
                                preferred_element_type=jnp.float32)   # (tq, tk)
        mask = qseg_ref[...] == kvseg_ref[...]                # (tq,1)==(1,tk) -> (tq,tk)
        s = jnp.where(mask, s, _MASK_VALUE)

        m_prev = m_sc[...]
        m_new = jnp.maximum(m_prev, jnp.max(s, axis=-1, keepdims=True))
        alpha = jnp.exp(m_prev - m_new)
        p = jnp.exp(s - m_new)
        l_sc[...] = alpha * l_sc[...] + jnp.sum(p, axis=-1, keepdims=True)
        acc_sc[...] = alpha * acc_sc[...] + jax.lax.dot_general(
            p.astype(compute_dtype), v_ref[0].astype(compute_dtype),
            (((1,), (0,)), ((), ())), preferred_element_type=jnp.float32)
        m_sc[...] = m_new

    @pl.when(ki == pl.num_programs(2) - 1)
    def _finalize():
        inv_l = pl.reciprocal(l_sc[...], approx=approx_recip)
        # TODO(synk): with d_head < 128 (demo: 8) this store is lane-masked; pick
        # d_head as a multiple of 128 at model-config level for lane-dense writes.
        o_ref[0] = (acc_sc[...] * inv_l).astype(o_ref.dtype)


def pallas_flash_attention(Q, K, V, q_seg, kv_seg,
                           qblk_lo, qblk_hi, kvblk_lo, kvblk_hi,
                           *, tq, tk, compute_dtype):
    """Q: (H, Tq, Dh), K/V: (H, Tkv, Dh), q_seg: (Tq,1), kv_seg: (1,Tkv) int32."""
    H, Tq, Dh = Q.shape
    Tkv = K.shape[1]
    nqb, nkb = Tq // tq, Tkv // tk
    scale = 1.0 / math.sqrt(Dh)                      # flex_attention default scale
    approx_recip = (compute_dtype == jnp.bfloat16)   # exact divide on the f32 path

    kernel = partial(flash_attn_kernel, scale=scale,
                     compute_dtype=compute_dtype, approx_recip=approx_recip)

    grid_spec = pltpu.PrefetchScalarGridSpec(
        num_scalar_prefetch=4,
        grid=(H, nqb, nkb),                          # KV (reduction) axis last
        in_specs=[
            pl.BlockSpec((1, tq, Dh), lambda h, qi, ki, qlo, qhi, klo, khi: (h, qi, 0)),
            pl.BlockSpec((1, tk, Dh), lambda h, qi, ki, qlo, qhi, klo, khi: (h, ki, 0)),
            pl.BlockSpec((1, tk, Dh), lambda h, qi, ki, qlo, qhi, klo, khi: (h, ki, 0)),
            pl.BlockSpec((tq, 1),     lambda h, qi, ki, qlo, qhi, klo, khi: (qi, 0)),
            pl.BlockSpec((1, tk),     lambda h, qi, ki, qlo, qhi, klo, khi: (0, ki)),
        ],
        out_specs=pl.BlockSpec((1, tq, Dh),
                               lambda h, qi, ki, qlo, qhi, klo, khi: (h, qi, 0)),
        scratch_shapes=[
            pltpu.VMEM((tq, 1), jnp.float32),        # running max
            pltpu.VMEM((tq, 1), jnp.float32),        # running denom
            pltpu.VMEM((tq, Dh), jnp.float32),       # output accumulator
        ],
    )

    return pl.pallas_call(
        kernel,
        out_shape=jax.ShapeDtypeStruct((H, Tq, Dh), Q.dtype),
        grid_spec=grid_spec,
        compiler_params=pltpu.CompilerParams(
            dimension_semantics=("parallel", "parallel", "arbitrary"),
            vmem_limit_bytes=_VMEM_LIMIT_BYTES),
    )(qblk_lo, qblk_hi, kvblk_lo, kvblk_hi, Q, K, V, q_seg, kv_seg)


# --------------------------- Params / segment ids ---------------------------- #

def init_params(key, d_model):
    """Deterministic torch.nn.Linear-style init for the 4 projections."""
    bound = 1.0 / math.sqrt(d_model)
    params = {}
    for name in ("q_proj", "k_proj", "v_proj", "out_proj"):
        key, kw, kb = jax.random.split(key, 3)
        params[name] = {
            "w": jax.random.uniform(kw, (d_model, d_model), jnp.float32, -bound, bound),
            "b": jax.random.uniform(kb, (d_model,), jnp.float32, -bound, bound),
        }
    return params


def prepare_params(params):
    """One-time prep: pre-transpose weights (no per-call transpose) and build the
    concatenated QKV weight used when q/k/v share the same input tensor."""
    prep = {}
    for name in ("q_proj", "k_proj", "v_proj", "out_proj"):
        prep[name] = {"wt": jnp.asarray(params[name]["w"]).T,
                      "b": jnp.asarray(params[name]["b"])}
    prep["qkv_fused"] = {
        "wt": jnp.concatenate([prep["q_proj"]["wt"], prep["k_proj"]["wt"],
                               prep["v_proj"]["wt"]], axis=1),
        "b": jnp.concatenate([prep["q_proj"]["b"], prep["k_proj"]["b"],
                              prep["v_proj"]["b"]]),
    }
    return prep


def _seg_ids(seq_lengths, total):
    assert sum(seq_lengths) == total
    ids = np.zeros((total,), dtype=np.int32)
    off = 0
    for i, length in enumerate(seq_lengths):
        ids[off:off + length] = i
        off += length
    return ids


# --------------------------- Module-level wrapper ---------------------------- #

def flex_attention_mha(prep, query, key, value, seq_lengths_q, seq_lengths_kv,
                       n_heads, compute_dtype=jnp.float32):
    total_q, d_model = query.shape
    total_kv = key.shape[0]
    d_head = d_model // n_heads

    if (query is key) and (key is value):
        # Self-attention fast path: single fused QKV projection pallas_call.
        qkv = pallas_linear(query, prep["qkv_fused"]["wt"], prep["qkv_fused"]["b"],
                            compute_dtype=compute_dtype)
        Q = qkv[:, :d_model]
        K = qkv[:, d_model:2 * d_model]
        V = qkv[:, 2 * d_model:]
    else:
        # Cross-attention (distinct inputs): projections cannot share an activation.
        Q = pallas_linear(query, prep["q_proj"]["wt"], prep["q_proj"]["b"],
                          compute_dtype=compute_dtype)
        K = pallas_linear(key, prep["k_proj"]["wt"], prep["k_proj"]["b"],
                          compute_dtype=compute_dtype)
        V = pallas_linear(value, prep["v_proj"]["wt"], prep["v_proj"]["b"],
                          compute_dtype=compute_dtype)

    # Row-major reinterpretation, exactly matching torch .view(1, H, T, Dh).
    Qh = Q.reshape(n_heads, total_q, d_head)
    Kh = K.reshape(n_heads, total_kv, d_head)
    Vh = V.reshape(n_heads, total_kv, d_head)

    # Segment ids + per-block segment-id ranges (host-side: lengths are static).
    q_seg_np = _seg_ids(seq_lengths_q, total_q)
    kv_seg_np = _seg_ids(seq_lengths_kv, total_kv)
    tq = _pick_tile(total_q, 256, 8)
    tk = _pick_tile(total_kv, 512, 128)
    nqb, nkb = total_q // tq, total_kv // tk
    qblk_lo = jnp.asarray(q_seg_np.reshape(nqb, tq).min(axis=1))
    qblk_hi = jnp.asarray(q_seg_np.reshape(nqb, tq).max(axis=1))
    kvblk_lo = jnp.asarray(kv_seg_np.reshape(nkb, tk).min(axis=1))
    kvblk_hi = jnp.asarray(kv_seg_np.reshape(nkb, tk).max(axis=1))
    q_seg = jnp.asarray(q_seg_np.reshape(total_q, 1))
    kv_seg = jnp.asarray(kv_seg_np.reshape(1, total_kv))

    attn = pallas_flash_attention(Qh, Kh, Vh, q_seg, kv_seg,
                                  qblk_lo, qblk_hi, kvblk_lo, kvblk_hi,
                                  tq=tq, tk=tk, compute_dtype=compute_dtype)
    attn = attn.reshape(total_q, d_model)                  # torch .view

    out = pallas_linear(attn, prep["out_proj"]["wt"], prep["out_proj"]["b"],
                        compute_dtype=compute_dtype)
    return out, seq_lengths_q


# ---------------------------------- Reference -------------------------------- #

def reference(params, query, key, value, seq_lengths_q, seq_lengths_kv, n_heads):
    total_q, d_model = query.shape
    total_kv = key.shape[0]
    d_head = d_model // n_heads
    lin = lambda x, p: x @ p["w"].T + p["b"]
    Q = lin(query, params["q_proj"]).reshape(n_heads, total_q, d_head)
    K = lin(key, params["k_proj"]).reshape(n_heads, total_kv, d_head)
    V = lin(value, params["v_proj"]).reshape(n_heads, total_kv, d_head)
    q_seg = jnp.asarray(_seg_ids(seq_lengths_q, total_q))
    kv_seg = jnp.asarray(_seg_ids(seq_lengths_kv, total_kv))
    mask = q_seg[:, None] == kv_seg[None, :]
    s = jnp.einsum("hqd,hkd->hqk", Q, K) / math.sqrt(d_head)
    s = jnp.where(mask[None], s, -jnp.inf)
    p = jax.nn.softmax(s, axis=-1)
    attn = jnp.einsum("hqk,hkd->hqd", p, V).reshape(total_q, d_model)
    return lin(attn, params["out_proj"])


# ------------------------------------ Main ------------------------------------ #

if __name__ == "__main__":
    d_model, n_heads = 32, 4
    seq_lengths_q = [10, 6]     # total_q  = 16
    seq_lengths_kv = [12, 4]    # total_kv = 16
    total_q = sum(seq_lengths_q)
    total_kv = sum(seq_lengths_kv)

    root = jax.random.PRNGKey(0)
    kparam, kq, kk, kv = jax.random.split(root, 4)
    params = init_params(kparam, d_model)
    prep = prepare_params(params)

    query = jax.random.normal(kq, (total_q, d_model), jnp.float32)
    key = jax.random.normal(kk, (total_kv, d_model), jnp.float32)
    value = jax.random.normal(kv, (total_kv, d_model), jnp.float32)

    # 1) Distinct q/k/v (the module's general signature), exact-precision f32 path.
    out, lens = flex_attention_mha(prep, query, key, value,
                                   seq_lengths_q, seq_lengths_kv, n_heads,
                                   compute_dtype=jnp.float32)
    out = jax.block_until_ready(out)
    ref = reference(params, query, key, value, seq_lengths_q, seq_lengths_kv, n_heads)
    np.testing.assert_allclose(np.asarray(out), np.asarray(ref), rtol=2e-4, atol=2e-4)
    assert out.shape == (total_q, d_model) and lens == seq_lengths_q

    # 2) Shared input (self-attention) exercising the fused-QKV path + bf16 MXU
    #    feeding + approx reciprocal (looser tolerance expected for bf16).
    out2, _ = flex_attention_mha(prep, query, query, query,
                                 seq_lengths_q, seq_lengths_q, n_heads,
                                 compute_dtype=jnp.bfloat16)
    out2 = jax.block_until_ready(out2)
    ref2 = reference(params, query, query, query, seq_lengths_q, seq_lengths_q, n_heads)
    np.testing.assert_allclose(np.asarray(out2), np.asarray(ref2), rtol=5e-2, atol=5e-2)

    print("KERNEL_OK")
</pallas_src>

<mosaic_0001>
module attributes {stable_mosaic.version = 11 : i64} {
  func.func @linear_kernel(%arg0: i32, %arg1: i32, %arg2: i32, %arg3: memref<16x32xf32, #tpu.memory_space<vmem>>, %arg4: memref<32x32xf32, #tpu.memory_space<vmem>>, %arg5: memref<1x32xf32, #tpu.memory_space<vmem>>, %arg6: memref<16x32xf32, #tpu.memory_space<vmem>>, %arg7: memref<16x32xf32, #tpu.memory_space<vmem>>) attributes {dimension_semantics = [#tpu.dimension_semantics<parallel>, #tpu.dimension_semantics<parallel>, #tpu.dimension_semantics<arbitrary>], iteration_bounds = array<i64: 1, 1, 1>, scalar_prefetch = 0 : i64, scratch_operands = 1 : i64, tpu.core_type = #tpu.core_type<tc>, window_params = [{transform_indices = @transform_0, window_bounds = array<i64: 16, 32>}, {transform_indices = @transform_1, window_bounds = array<i64: 32, 32>}, {transform_indices = @transform_2, window_bounds = array<i64: 1, 32>}, {transform_indices = @transform_3, window_bounds = array<i64: 16, 32>}]} {
    %c0_i32 = arith.constant 0 : i32
    %0 = arith.cmpi eq, %arg2, %c0_i32 : i32
    %1 = arith.extui %0 : i1 to i32
    %c0_i32_0 = arith.constant 0 : i32
    %2 = arith.cmpi ne, %1, %c0_i32_0 : i32
    scf.if %2 {
      %cst_10 = arith.constant 0.000000e+00 : f32
      %12 = vector.broadcast %cst_10 : f32 to vector<16x32xf32>
      %c0_11 = arith.constant 0 : index
      %c0_12 = arith.constant 0 : index
      %13 = vector.load %arg7[%c0_11, %c0_12] : memref<16x32xf32, #tpu.memory_space<vmem>>, vector<16x32xf32>
      tpu.vector_store %arg7[%c0_11, %c0_12], %12 {strides = array<i32>} : memref<16x32xf32, #tpu.memory_space<vmem>>, vector<16x32xf32>,
    } else {
    }
    %c0 = arith.constant 0 : index
    %c0_1 = arith.constant 0 : index
    %3 = vector.load %arg7[%c0, %c0_1] : memref<16x32xf32, #tpu.memory_space<vmem>>, vector<16x32xf32>
    %c0_2 = arith.constant 0 : index
    %c0_3 = arith.constant 0 : index
    %4 = vector.load %arg3[%c0_2, %c0_3] : memref<16x32xf32, #tpu.memory_space<vmem>>, vector<16x32xf32>
    %c0_4 = arith.constant 0 : index
    %c0_5 = arith.constant 0 : index
    %5 = vector.load %arg4[%c0_4, %c0_5] : memref<32x32xf32, #tpu.memory_space<vmem>>, vector<32x32xf32>
    %cst = arith.constant dense<0.000000e+00> : vector<16x32xf32>
    %6 = tpu.matmul %4, %5, %cst {dimension_numbers = #tpu.dot_dimension_numbers<[1], [0], [0], [1], [0, 0, 1, 1], [], []>} : vector<16x32xf32>, vector<32x32xf32>, vector<16x32xf32> -> vector<16x32xf32>
    %7 = arith.addf %3, %6 : vector<16x32xf32>
    %c0_6 = arith.constant 0 : index
    %c0_7 = arith.constant 0 : index
    %8 = vector.load %arg7[%c0_6, %c0_7] : memref<16x32xf32, #tpu.memory_space<vmem>>, vector<16x32xf32>
    tpu.vector_store %arg7[%c0_6, %c0_7], %7 {strides = array<i32>} : memref<16x32xf32, #tpu.memory_space<vmem>>, vector<16x32xf32>,
    %c0_i32_8 = arith.constant 0 : i32
    %9 = arith.cmpi eq, %arg2, %c0_i32_8 : i32
    %10 = arith.extui %9 : i1 to i32
    %c0_i32_9 = arith.constant 0 : i32
    %11 = arith.cmpi ne, %10, %c0_i32_9 : i32
    scf.if %11 {
      %c0_10 = arith.constant 0 : index
      %c0_11 = arith.constant 0 : index
      %12 = vector.load %arg7[%c0_10, %c0_11] : memref<16x32xf32, #tpu.memory_space<vmem>>, vector<16x32xf32>
      %c0_12 = arith.constant 0 : index
      %c0_13 = arith.constant 0 : index
      %13 = vector.load %arg5[%c0_12, %c0_13] : memref<1x32xf32, #tpu.memory_space<vmem>>, vector<1x32xf32>
      %14 = vector.broadcast %13 : vector<1x32xf32> to vector<16x32xf32>
      %15 = arith.addf %12, %14 : vector<16x32xf32>
      %c0_14 = arith.constant 0 : index
      %c0_15 = arith.constant 0 : index
      %16 = vector.load %arg6[%c0_14, %c0_15] : memref<16x32xf32, #tpu.memory_space<vmem>>, vector<16x32xf32>
      tpu.vector_store %arg6[%c0_14, %c0_15], %15 {strides = array<i32>} : memref<16x32xf32, #tpu.memory_space<vmem>>, vector<16x32xf32>,
    } else {
    }
    return
  }
  func.func @transform_0(%arg0: i32, %arg1: i32, %arg2: i32) -> (i32, i32) {
    %c0_i32 = arith.constant 0 : i32
    return %arg0, %arg2 : i32, i32
  }
  func.func @transform_1(%arg0: i32, %arg1: i32, %arg2: i32) -> (i32, i32) {
    %c0_i32 = arith.constant 0 : i32
    return %arg2, %arg1 : i32, i32
  }
  func.func @transform_2(%arg0: i32, %arg1: i32, %arg2: i32) -> (i32, i32) {
    %c0_i32 = arith.constant 0 : i32
    %c0_i32_0 = arith.constant 0 : i32
    return %c0_i32, %arg1 : i32, i32
  }
  func.func @transform_3(%arg0: i32, %arg1: i32, %arg2: i32) -> (i32, i32) {
    %c0_i32 = arith.constant 0 : i32
    return %arg0, %arg1 : i32, i32
  }
}

</mosaic_0001>

<bundles_post_ra>
// kernel: tpu_custom_call.1
= control target key start
LH: loop header
LB: loop body
LE: loop exit
PB: predicated region body
PF: predicated region fallthrough
CT: control target
= control target key end

     0   :  { %8 = vsyncpa [#allocation4], 0  ;;  %s325_s0 = inlined_call_operand.hbm [shape: f32[16,32], index: 0, kind: input, shape index: {}]   ;;  %s326_s1 = inlined_call_operand.hbm [shape: f32[32,32], index: 1, kind: input, shape index: {}]   ;;  %s327_s2 = inlined_call_operand.vmem [shape: f32[1,32], index: 2, kind: input, shape index: {}]   ;;  %s328_s3 = inlined_call_operand.hbm [shape: f32[16,32], index: 3, kind: output, shape index: {}]  }
   0x1   :  { %9 = vsyncpa [#allocation7], 0 }
   0x2   :  { %10 = vsyncpa [#allocation5], 0  ;;  %s270_s12 = smov [#allocation3]  }
   0x3   :  { %s16_s13 = sshll.u32 %s270_s12, 4  ;;  %s17_s13 = int_to_ptr.vmem [resolvable:$true] %s16_s13 }
   0x4   :  { %s212_s14 = scalar_lea.vmem %s17_s13, 256  ;;  %p217_p1 = scmp.lt.s32.totalorder %s17_s13, %s17_s13 }
   0x5   :  { %p213_p0 = scmp.ne.s32.totalorder %s17_s13, %s212_s14  ;;  %p218_p2 = scmp.lt.s32.totalorder %s212_s14, %s212_s14 }
   0x7   :  { %p219_p3 = por %p218_p2, %p217_p1 }
   0x9   :  { %p220_p4 = pnand %p219_p3, %p213_p0 }
   0xb   :  { %223 = shalt.err (!%p220_p4)
}
   0xc   :  { %s271_s15 = smov 128   ;;  %s272_s16 = smov 8  }
   0xd   :  { %22 = dma.hbm_to_vmem [thread:$0]  %s325_s0, 256, %s17_s13, [#allocation4], %s271_s15, %s271_s15, %s272_s16  }
   0xe   :  { %s273_s19 = smov [#allocation6]  }
   0xf   :  { %s28_s20 = sshll.u32 %s273_s19, 4  ;;  %s29_s20 = int_to_ptr.vmem [resolvable:$true] %s28_s20 }
  0x10   :  { %s232_s21 = scalar_lea.vmem %s29_s20, 512  ;;  %p237_p6 = scmp.lt.s32.totalorder %s29_s20, %s29_s20 }
  0x11   :  { %p233_p5 = scmp.ne.s32.totalorder %s29_s20, %s232_s21  ;;  %p238_p7 = scmp.lt.s32.totalorder %s232_s21, %s232_s21 }
  0x13   :  { %p239_p8 = por %p238_p7, %p237_p6 }
  0x15   :  { %p240_p9 = pnand %p239_p8, %p233_p5 }
  0x17   :  { %243 = shalt.err (!%p240_p9)
}
  0x18   :  { %34 = dma.hbm_to_vmem [thread:$0]  %s326_s1, 512, %s29_s20, [#allocation7], %s271_s15, %s271_s15, %s272_s16  }
  0x19   :  { %264 = dma.done.wait [#allocation4], 256  }
  0x1a   :  { %265 = vsyncadd [#allocation4], 4294967040 }
  0x1b   :  { %266 = dma.done.wait [#allocation7], 512  }
  0x1c   :  { %267 = vsyncadd [#allocation7], 4294966784  ;;  %vm47_vm0 = vcmask 261120   ;;  %v274_v0 = vmov 0.0   ;;  %v57_v1 = vld [vmem:[#allocation6 + $0x18] sm:$0xff]  ;;  %v56_v2 = vld [vmem:[#allocation6 + $0x10] sm:$0xff] }
  0x1d   :  { %49 = vst.msk [vmem:[#allocation2 + $0x8] sm:$0xff] %vm47_vm0, %v274_v0  ;;  %48 = vst.msk [vmem:[#allocation2] sm:$0xff] %vm47_vm0, %v274_v0  ;;  %187 = vmatprep.subr.mxu0 %v57_v1  ;;  %v52_v3 = vld [vmem:[#allocation3] sm:$0xff]  ;;  %v55_v4 = vld [vmem:[#allocation6 + $0x8] sm:$0xff]  ;;  %s275_s24 = smov [#allocation8]  }
  0x1e   :  { %188 = vmatpush3.msra.mxu0 %v57_v1  ;;  %195 = vmatprep.mubr.msk.f32.mxu0 %vm47_vm0, %v52_v3  ;;  %v54_v5 = vld [vmem:[#allocation6] sm:$0xff]  ;;  %v53_v6 = vld [vmem:[#allocation3 + $0x8] sm:$0xff]  ;;  %s165_s25 = sshll.u32 %s275_s24, 4  ;;  %s166_s25 = int_to_ptr.vmem [resolvable:$true] %s165_s25 }
  0x1f   :  { %189 = vmatprep.subr.mxu0 %v56_v2  ;;  %v180_v13 = vld [vmem:[%s327_s2] ss:$0 sm:$0xff]  ;;  %s244_s26 = scalar_lea.vmem %s166_s25, 256  ;;  %p249_p11 = scmp.lt.s32.totalorder %s166_s25, %s166_s25 }
  0x20   :  { %190 = vmatpush3.msra.mxu0 %v56_v2  ;;  %p245_p10 = scmp.ne.s32.totalorder %s166_s25, %s244_s26  ;;  %p250_p12 = scmp.lt.s32.totalorder %s244_s26, %s244_s26 }
  0x21   :  { %191 = vmatprep.subr.mxu0 %v55_v4 }
  0x22   :  { %192 = vmatpush3.msra.mxu0 %v55_v4  ;;  %p251_p13 = por %p250_p12, %p249_p11 }
  0x23   :  { %193 = vmatprep.subr.mxu0 %v54_v5 }
  0x24   :  { %194 = vmatpush3.msra.mxu0 %v54_v5  ;;  %v51_v7 = vld [vmem:[#allocation2 + $0x8] sm:$0xff]  ;;  %v50_v9 = vld [vmem:[#allocation2] sm:$0xff]  ;;  %p252_p0 = pnand %p251_p13, %p245_p10 }
  0x25   :  { %196 = vmatmul.mubr.msk.f32.vlgmr.msra.gmra.mxu0 %vm47_vm0, %v53_v6 }
  0xe5   :  { %v197_v8 = vpop.f32.mrf.mxu0 }
  0xe6   :  { %v141_v10 = vadd.f32 %v197_v8, %v51_v7 }
  0xe7   :  { %v131_v11 = vpop.f32.mrf.mxu0 }
  0xe8   :  { %143 = vst.msk [vmem:[#allocation2 + $0x8] sm:$0xff] %vm47_vm0, %v141_v10  ;;  %v140_v12 = vadd.f32 %v131_v11, %v50_v9 }
  0xea   :  { %142 = vst.msk [vmem:[#allocation2] sm:$0xff] %vm47_vm0, %v140_v12 }
  0xef   :  { %v148_v14 = vld [vmem:[#allocation2 + $0x8] sm:$0xff] }
  0xf0   :  { %v157_v15 = vadd.f32 %v180_v13, %v148_v14 }
  0xf1   :  { %v147_v16 = vld [vmem:[#allocation2] sm:$0xff] }
  0xf2   :  { %v156_v17 = vadd.f32 %v180_v13, %v147_v16  ;;  %159 = vst.msk [vmem:[#allocation8 + $0x8] sm:$0xff] %vm47_vm0, %v157_v15 }
  0xf4   :  { %158 = vst.msk [vmem:[#allocation8] sm:$0xff] %vm47_vm0, %v156_v17 }
  0xf5   :  { %255 = shalt.err (!%p252_p0)
}
  0xf6   :  { %171 = dma.vmem_to_hbm [thread:$0]  %s166_s25, 256, %s328_s3, [#allocation5], %s271_s15, %s271_s15, %s272_s16  }
  0xf7   :  { %268 = dma.done.wait [#allocation5], 256  }
  0xf8   :  { %269 = vsyncadd [#allocation5], 4294967040 }
  0xf9   :  { %175 = vsyncpa [#allocation4], 1 }
  0xfa   :  { %176 = vsyncpa [#allocation7], 1 }
  0xfb   :  { %177 = vsyncpa [#allocation5], 1 }

</bundles_post_ra>
